<compile_context>
chip_gen: v6e
topology: v6e:2x2x1
jax: 0.10.0
libtpu: 0.0.40
codegen_flags: <defaults>
</compile_context>

<pallas_src>
import functools

import jax
import jax.numpy as jnp
from jax.experimental import pallas as pl
from jax.experimental.pallas import tpu as pltpu

SELU_ALPHA = 1.6732632423543772
SELU_SCALE = 1.0507009873554805

LANE = 128       # TPU lane width: last-dim tile granularity
SUBLANE = 8      # f32 sublane granularity


def _selu(x):
    # exp() lowers to the EUP slot; the scale / where stay on the VPU.
    return SELU_SCALE * jnp.where(x > 0, x, SELU_ALPHA * (jnp.exp(x) - 1.0))


def _round_up(v, m):
    return (v + m - 1) // m * m


def _pad2(a, rows, cols):
    r, c = a.shape
    if r == rows and c == cols:
        return a
    return jnp.pad(a, ((0, rows - r), (0, cols - c)))


def _make_layer_kernel(block_has_shortcut):
    """Build the fused whole-layer kernel.

    Ref order: (x_ref, *weight_refs..., o_ref) where each block contributes
    (w1, b1, w2, b2[, ws, bs]) in order.
    """

    def kernel(x_ref, *refs):
        o_ref = refs[-1]
        w = refs[:-1]
        h = x_ref[...].astype(jnp.float32)
        idx = 0
        for has_sc in block_has_shortcut:          # static Python unroll
            w1 = w[idx][...]
            b1 = w[idx + 1][...]
            w2 = w[idx + 2][...]
            b2 = w[idx + 3][...]
            idx += 4
            if has_sc:
                ws = w[idx][...]
                bs = w[idx + 1][...]
                idx += 2
                # Independent shortcut matmul first: its MXU work overlaps the
                # elementwise SELU epilogue of the main branch.
                res = jnp.dot(h, ws, preferred_element_type=jnp.float32) + bs
            else:
                res = h
            t = _selu(jnp.dot(h, w1, preferred_element_type=jnp.float32) + b1)
            t = jnp.dot(t, w2, preferred_element_type=jnp.float32) + b2
            h = _selu(t + res)
        o_ref[...] = h.astype(o_ref.dtype)

    return kernel


@functools.partial(jax.jit, static_argnames=("block_rows",))
def resnet_layer_forward(x, params, *, block_rows=512):
    """Fused ResNetLayer forward: one pallas_call for the full block stack."""
    n, in_c = x.shape
    out_c = params[-1]["w2"].shape[1]

    cin_pad = _round_up(in_c, LANE)
    cout_pad = _round_up(out_c, LANE)

    # Batch tile: as large as practical (hides DMA behind compute), always a
    # multiple of the 8-row sublane granularity.
    if n <= block_rows:
        tm = _round_up(n, SUBLANE)
        n_pad = tm
    else:
        tm = block_rows
        n_pad = _round_up(n, tm)

    x_pad = _pad2(x, n_pad, cin_pad)

    # Flatten + lane-pad all block parameters. Zero padding keeps results
    # identical: padded input columns are zero, padded weight rows/cols are
    # zero, padded biases are zero, and selu(0) == 0.
    flat_args = []
    block_has_shortcut = []
    c_pads = [cin_pad]
    for p in params:
        c_in_b, c_mid = p["w1"].shape
        c_out_b = p["w2"].shape[1]
        cinb_pad = _round_up(c_in_b, LANE)
        cmid_pad = _round_up(c_mid, LANE)
        coutb_pad = _round_up(c_out_b, LANE)
        has_sc = "ws" in p
        flat_args += [
            _pad2(p["w1"], cinb_pad, cmid_pad),
            _pad2(p["b1"], 1, cmid_pad),
            _pad2(p["w2"], cmid_pad, coutb_pad),
            _pad2(p["b2"], 1, coutb_pad),
        ]
        if has_sc:
            flat_args += [
                _pad2(p["ws"], cinb_pad, coutb_pad),
                _pad2(p["bs"], 1, coutb_pad),
            ]
        block_has_shortcut.append(has_sc)
        c_pads += [cmid_pad, coutb_pad]

    kernel = _make_layer_kernel(tuple(block_has_shortcut))

    grid = (n_pad // tm,)

    # x / out tiles stream over the batch grid; weights are VMEM-resident.
    in_specs = [pl.BlockSpec((tm, cin_pad), lambda i: (i, 0))]
    for a in flat_args:
        in_specs.append(pl.BlockSpec(a.shape, lambda i: (0, 0)))
    out_specs = pl.BlockSpec((tm, cout_pad), lambda i: (i, 0))

    # --- advisory cost estimate (padded sizes) ---
    flops = 0
    transcendentals = 0
    c_prev = cin_pad
    for p, has_sc in zip(params, block_has_shortcut):
        cmid_pad = _round_up(p["w1"].shape[1], LANE)
        coutb_pad = _round_up(p["w2"].shape[1], LANE)
        flops += 2 * n_pad * (c_prev * cmid_pad + cmid_pad * coutb_pad)
        if has_sc:
            flops += 2 * n_pad * c_prev * coutb_pad
        transcendentals += n_pad * (cmid_pad + coutb_pad)
        c_prev = coutb_pad

    weight_bytes = sum(int(a.size) * a.dtype.itemsize for a in flat_args)
    bytes_accessed = (int(x_pad.size) * x_pad.dtype.itemsize
                      + n_pad * cout_pad * x.dtype.itemsize
                      + weight_bytes)

    # --- explicit VMEM budget: double-buffered activation tiles + resident
    # weights + headroom for the fused intermediates. Clamped so it stays
    # comfortably under v7x's 64 MiB physical VMEM. ---
    cmax_pad = max(c_pads)
    act_bytes = 2 * tm * (cin_pad + cout_pad) * 4
    scratch_bytes = 6 * tm * cmax_pad * 4
    vmem_limit = int(min(max(2 * weight_bytes + act_bytes + scratch_bytes
                             + (4 << 20), 24 << 20), 56 << 20))

    out_pad = pl.pallas_call(
        kernel,
        out_shape=jax.ShapeDtypeStruct((n_pad, cout_pad), x.dtype),
        grid=grid,
        in_specs=in_specs,
        out_specs=out_specs,
        compiler_params=pltpu.CompilerParams(
            dimension_semantics=("parallel",),
            vmem_limit_bytes=vmem_limit,
        ),
        cost_estimate=pl.CostEstimate(
            flops=int(flops),
            transcendentals=int(transcendentals),
            bytes_accessed=int(bytes_accessed),
        ),
    )(x_pad, *flat_args)

    return out_pad[:n, :out_c]


def init_resnet_layer_params(key, in_channels, out_channels, n=1,
                             dtype=jnp.float32):
    """Deterministic parameter init mirroring the PyTorch module shapes.

    Weights are stored as [in_features, out_features] (transposed vs. torch).
    Biases are stored as [1, out_features] for clean 2-D broadcasting on TPU.
    """
    expansion = 1  # ResNetBasicBlock.expansion
    params = []
    chans = [(in_channels, out_channels)] + \
            [(out_channels * expansion, out_channels) for _ in range(n - 1)]
    for (cin, cout) in chans:
        exp_c = cout * expansion
        key, k1, k2, k3, k4, k5, k6 = jax.random.split(key, 7)
        block = {
            "w1": (jax.random.normal(k1, (cin, cout), dtype) * 0.05),
            "b1": (jax.random.normal(k2, (1, cout), dtype) * 0.05),
            "w2": (jax.random.normal(k3, (cout, exp_c), dtype) * 0.05),
            "b2": (jax.random.normal(k4, (1, exp_c), dtype) * 0.05),
        }
        if cin != exp_c:
            block["ws"] = (jax.random.normal(k5, (cin, exp_c), dtype) * 0.05)
            block["bs"] = (jax.random.normal(k6, (1, exp_c), dtype) * 0.05)
        params.append(block)
    return params


def _reference_forward(x, params):
    """Pure-JAX reference (mirrors the PyTorch forward) for sanity checking."""
    for p in params:
        h = _selu(x @ p["w1"] + p["b1"])
        h = h @ p["w2"] + p["b2"]
        res = x @ p["ws"] + p["bs"] if "ws" in p else x
        x = _selu(h + res)
    return x


if __name__ == "__main__":
    key = jax.random.PRNGKey(0)
    k_x, k_p = jax.random.split(key)

    batch = 8
    in_channels = 32
    out_channels = 64
    n_blocks = 2  # first block uses the Linear shortcut, second uses identity

    x = jax.random.normal(k_x, (batch, in_channels), jnp.float32)
    params = init_resnet_layer_params(k_p, in_channels, out_channels, n=n_blocks)

    out = resnet_layer_forward(x, params)
    out = jax.block_until_ready(out)

    ref = _reference_forward(x, params)
    assert out.shape == (batch, out_channels), out.shape
    assert jnp.allclose(out, ref, atol=1e-4, rtol=1e-4), "mismatch vs reference"

    print("KERNEL_OK")
</pallas_src>

<mosaic_0001>
module attributes {stable_mosaic.version = 11 : i64} {
  func.func @kernel(%arg0: i32, %arg1: memref<8x128xf32, #tpu.memory_space<vmem>>, %arg2: memref<128x128xf32, #tpu.memory_space<vmem>>, %arg3: memref<1x128xf32, #tpu.memory_space<vmem>>, %arg4: memref<128x128xf32, #tpu.memory_space<vmem>>, %arg5: memref<1x128xf32, #tpu.memory_space<vmem>>, %arg6: memref<128x128xf32, #tpu.memory_space<vmem>>, %arg7: memref<1x128xf32, #tpu.memory_space<vmem>>, %arg8: memref<128x128xf32, #tpu.memory_space<vmem>>, %arg9: memref<1x128xf32, #tpu.memory_space<vmem>>, %arg10: memref<128x128xf32, #tpu.memory_space<vmem>>, %arg11: memref<1x128xf32, #tpu.memory_space<vmem>>, %arg12: memref<8x128xf32, #tpu.memory_space<vmem>>) attributes {dimension_semantics = [#tpu.dimension_semantics<parallel>], iteration_bounds = array<i64: 1>, scalar_prefetch = 0 : i64, scratch_operands = 0 : i64, tpu.core_type = #tpu.core_type<tc>, window_params = [{transform_indices = @transform_0, window_bounds = array<i64: 8, 128>}, {pipeline_mode = #tpu.pipeline_mode<synchronous>, transform_indices = @transform_1, window_bounds = array<i64: 128, 128>}, {pipeline_mode = #tpu.pipeline_mode<synchronous>, transform_indices = @transform_2, window_bounds = array<i64: 1, 128>}, {pipeline_mode = #tpu.pipeline_mode<synchronous>, transform_indices = @transform_3, window_bounds = array<i64: 128, 128>}, {pipeline_mode = #tpu.pipeline_mode<synchronous>, transform_indices = @transform_4, window_bounds = array<i64: 1, 128>}, {pipeline_mode = #tpu.pipeline_mode<synchronous>, transform_indices = @transform_5, window_bounds = array<i64: 128, 128>}, {pipeline_mode = #tpu.pipeline_mode<synchronous>, transform_indices = @transform_6, window_bounds = array<i64: 1, 128>}, {pipeline_mode = #tpu.pipeline_mode<synchronous>, transform_indices = @transform_7, window_bounds = array<i64: 128, 128>}, {pipeline_mode = #tpu.pipeline_mode<synchronous>, transform_indices = @transform_8, window_bounds = array<i64: 1, 128>}, {pipeline_mode = #tpu.pipeline_mode<synchronous>, transform_indices = @transform_9, window_bounds = array<i64: 128, 128>}, {pipeline_mode = #tpu.pipeline_mode<synchronous>, transform_indices = @transform_10, window_bounds = array<i64: 1, 128>}, {transform_indices = @transform_11, window_bounds = array<i64: 8, 128>}]} {
    %c0 = arith.constant 0 : index
    %c0_0 = arith.constant 0 : index
    %0 = vector.load %arg1[%c0, %c0_0] : memref<8x128xf32, #tpu.memory_space<vmem>>, vector<8x128xf32>
    %c0_1 = arith.constant 0 : index
    %c0_2 = arith.constant 0 : index
    %1 = vector.load %arg2[%c0_1, %c0_2] : memref<128x128xf32, #tpu.memory_space<vmem>>, vector<128x128xf32>
    %c0_3 = arith.constant 0 : index
    %c0_4 = arith.constant 0 : index
    %2 = vector.load %arg3[%c0_3, %c0_4] : memref<1x128xf32, #tpu.memory_space<vmem>>, vector<1x128xf32>
    %c0_5 = arith.constant 0 : index
    %c0_6 = arith.constant 0 : index
    %3 = vector.load %arg4[%c0_5, %c0_6] : memref<128x128xf32, #tpu.memory_space<vmem>>, vector<128x128xf32>
    %c0_7 = arith.constant 0 : index
    %c0_8 = arith.constant 0 : index
    %4 = vector.load %arg5[%c0_7, %c0_8] : memref<1x128xf32, #tpu.memory_space<vmem>>, vector<1x128xf32>
    %c0_9 = arith.constant 0 : index
    %c0_10 = arith.constant 0 : index
    %5 = vector.load %arg6[%c0_9, %c0_10] : memref<128x128xf32, #tpu.memory_space<vmem>>, vector<128x128xf32>
    %c0_11 = arith.constant 0 : index
    %c0_12 = arith.constant 0 : index
    %6 = vector.load %arg7[%c0_11, %c0_12] : memref<1x128xf32, #tpu.memory_space<vmem>>, vector<1x128xf32>
    %cst = arith.constant dense<0.000000e+00> : vector<8x128xf32>
    %7 = tpu.matmul %0, %5, %cst {dimension_numbers = #tpu.dot_dimension_numbers<[1], [0], [0], [1], [0, 0, 1, 1], [], []>} : vector<8x128xf32>, vector<128x128xf32>, vector<8x128xf32> -> vector<8x128xf32>
    %8 = vector.broadcast %6 : vector<1x128xf32> to vector<8x128xf32>
    %9 = arith.addf %7, %8 : vector<8x128xf32>
    %cst_13 = arith.constant dense<0.000000e+00> : vector<8x128xf32>
    %10 = tpu.matmul %0, %1, %cst_13 {dimension_numbers = #tpu.dot_dimension_numbers<[1], [0], [0], [1], [0, 0, 1, 1], [], []>} : vector<8x128xf32>, vector<128x128xf32>, vector<8x128xf32> -> vector<8x128xf32>
    %11 = vector.broadcast %2 : vector<1x128xf32> to vector<8x128xf32>
    %12 = arith.addf %10, %11 : vector<8x128xf32>
    %cst_14 = arith.constant 0.000000e+00 : f32
    %13 = vector.broadcast %cst_14 : f32 to vector<8x128xf32>
    %14 = arith.cmpf ogt, %12, %13 : vector<8x128xf32>
    %15 = math.exp %12 : vector<8x128xf32>
    %cst_15 = arith.constant 1.000000e+00 : f32
    %16 = vector.broadcast %cst_15 : f32 to vector<8x128xf32>
    %17 = arith.subf %15, %16 : vector<8x128xf32>
    %cst_16 = arith.constant 1.67326319 : f32
    %18 = vector.broadcast %cst_16 : f32 to vector<8x128xf32>
    %19 = arith.mulf %18, %17 : vector<8x128xf32>
    %20 = arith.select %14, %12, %19 : vector<8x128xi1>, vector<8x128xf32>
    %cst_17 = arith.constant 1.05070102 : f32
    %21 = vector.broadcast %cst_17 : f32 to vector<8x128xf32>
    %22 = arith.mulf %21, %20 : vector<8x128xf32>
    %cst_18 = arith.constant dense<0.000000e+00> : vector<8x128xf32>
    %23 = tpu.matmul %22, %3, %cst_18 {dimension_numbers = #tpu.dot_dimension_numbers<[1], [0], [0], [1], [0, 0, 1, 1], [], []>} : vector<8x128xf32>, vector<128x128xf32>, vector<8x128xf32> -> vector<8x128xf32>
    %24 = vector.broadcast %4 : vector<1x128xf32> to vector<8x128xf32>
    %25 = arith.addf %23, %24 : vector<8x128xf32>
    %26 = arith.addf %25, %9 : vector<8x128xf32>
    %cst_19 = arith.constant 0.000000e+00 : f32
    %27 = vector.broadcast %cst_19 : f32 to vector<8x128xf32>
    %28 = arith.cmpf ogt, %26, %27 : vector<8x128xf32>
    %29 = math.exp %26 : vector<8x128xf32>
    %cst_20 = arith.constant 1.000000e+00 : f32
    %30 = vector.broadcast %cst_20 : f32 to vector<8x128xf32>
    %31 = arith.subf %29, %30 : vector<8x128xf32>
    %cst_21 = arith.constant 1.67326319 : f32
    %32 = vector.broadcast %cst_21 : f32 to vector<8x128xf32>
    %33 = arith.mulf %32, %31 : vector<8x128xf32>
    %34 = arith.select %28, %26, %33 : vector<8x128xi1>, vector<8x128xf32>
    %cst_22 = arith.constant 1.05070102 : f32
    %35 = vector.broadcast %cst_22 : f32 to vector<8x128xf32>
    %36 = arith.mulf %35, %34 : vector<8x128xf32>
    %c0_23 = arith.constant 0 : index
    %c0_24 = arith.constant 0 : index
    %37 = vector.load %arg8[%c0_23, %c0_24] : memref<128x128xf32, #tpu.memory_space<vmem>>, vector<128x128xf32>
    %c0_25 = arith.constant 0 : index
    %c0_26 = arith.constant 0 : index
    %38 = vector.load %arg9[%c0_25, %c0_26] : memref<1x128xf32, #tpu.memory_space<vmem>>, vector<1x128xf32>
    %c0_27 = arith.constant 0 : index
    %c0_28 = arith.constant 0 : index
    %39 = vector.load %arg10[%c0_27, %c0_28] : memref<128x128xf32, #tpu.memory_space<vmem>>, vector<128x128xf32>
    %c0_29 = arith.constant 0 : index
    %c0_30 = arith.constant 0 : index
    %40 = vector.load %arg11[%c0_29, %c0_30] : memref<1x128xf32, #tpu.memory_space<vmem>>, vector<1x128xf32>
    %cst_31 = arith.constant dense<0.000000e+00> : vector<8x128xf32>
    %41 = tpu.matmul %36, %37, %cst_31 {dimension_numbers = #tpu.dot_dimension_numbers<[1], [0], [0], [1], [0, 0, 1, 1], [], []>} : vector<8x128xf32>, vector<128x128xf32>, vector<8x128xf32> -> vector<8x128xf32>
    %42 = vector.broadcast %38 : vector<1x128xf32> to vector<8x128xf32>
    %43 = arith.addf %41, %42 : vector<8x128xf32>
    %cst_32 = arith.constant 0.000000e+00 : f32
    %44 = vector.broadcast %cst_32 : f32 to vector<8x128xf32>
    %45 = arith.cmpf ogt, %43, %44 : vector<8x128xf32>
    %46 = math.exp %43 : vector<8x128xf32>
    %cst_33 = arith.constant 1.000000e+00 : f32
    %47 = vector.broadcast %cst_33 : f32 to vector<8x128xf32>
    %48 = arith.subf %46, %47 : vector<8x128xf32>
    %cst_34 = arith.constant 1.67326319 : f32
    %49 = vector.broadcast %cst_34 : f32 to vector<8x128xf32>
    %50 = arith.mulf %49, %48 : vector<8x128xf32>
    %51 = arith.select %45, %43, %50 : vector<8x128xi1>, vector<8x128xf32>
    %cst_35 = arith.constant 1.05070102 : f32
    %52 = vector.broadcast %cst_35 : f32 to vector<8x128xf32>
    %53 = arith.mulf %52, %51 : vector<8x128xf32>
    %cst_36 = arith.constant dense<0.000000e+00> : vector<8x128xf32>
    %54 = tpu.matmul %53, %39, %cst_36 {dimension_numbers = #tpu.dot_dimension_numbers<[1], [0], [0], [1], [0, 0, 1, 1], [], []>} : vector<8x128xf32>, vector<128x128xf32>, vector<8x128xf32> -> vector<8x128xf32>
    %55 = vector.broadcast %40 : vector<1x128xf32> to vector<8x128xf32>
    %56 = arith.addf %54, %55 : vector<8x128xf32>
    %57 = arith.addf %56, %36 : vector<8x128xf32>
    %cst_37 = arith.constant 0.000000e+00 : f32
    %58 = vector.broadcast %cst_37 : f32 to vector<8x128xf32>
    %59 = arith.cmpf ogt, %57, %58 : vector<8x128xf32>
    %60 = math.exp %57 : vector<8x128xf32>
    %cst_38 = arith.constant 1.000000e+00 : f32
    %61 = vector.broadcast %cst_38 : f32 to vector<8x128xf32>
    %62 = arith.subf %60, %61 : vector<8x128xf32>
    %cst_39 = arith.constant 1.67326319 : f32
    %63 = vector.broadcast %cst_39 : f32 to vector<8x128xf32>
    %64 = arith.mulf %63, %62 : vector<8x128xf32>
    %65 = arith.select %59, %57, %64 : vector<8x128xi1>, vector<8x128xf32>
    %cst_40 = arith.constant 1.05070102 : f32
    %66 = vector.broadcast %cst_40 : f32 to vector<8x128xf32>
    %67 = arith.mulf %66, %65 : vector<8x128xf32>
    %c0_41 = arith.constant 0 : index
    %c0_42 = arith.constant 0 : index
    %68 = vector.load %arg12[%c0_41, %c0_42] : memref<8x128xf32, #tpu.memory_space<vmem>>, vector<8x128xf32>
    tpu.vector_store %arg12[%c0_41, %c0_42], %67 {strides = array<i32>} : memref<8x128xf32, #tpu.memory_space<vmem>>, vector<8x128xf32>,
    return
  }
  func.func @transform_0(%arg0: i32) -> (i32, i32) {
    %c0_i32 = arith.constant 0 : i32
    %c0_i32_0 = arith.constant 0 : i32
    return %arg0, %c0_i32 : i32, i32
  }
  func.func @transform_1(%arg0: i32) -> (i32, i32) {
    %c0_i32 = arith.constant 0 : i32
    %c0_i32_0 = arith.constant 0 : i32
    %c0_i32_1 = arith.constant 0 : i32
    return %c0_i32, %c0_i32_0 : i32, i32
  }
  func.func @transform_2(%arg0: i32) -> (i32, i32) {
    %c0_i32 = arith.constant 0 : i32
    %c0_i32_0 = arith.constant 0 : i32
    %c0_i32_1 = arith.constant 0 : i32
    return %c0_i32, %c0_i32_0 : i32, i32
  }
  func.func @transform_3(%arg0: i32) -> (i32, i32) {
    %c0_i32 = arith.constant 0 : i32
    %c0_i32_0 = arith.constant 0 : i32
    %c0_i32_1 = arith.constant 0 : i32
    return %c0_i32, %c0_i32_0 : i32, i32
  }
  func.func @transform_4(%arg0: i32) -> (i32, i32) {
    %c0_i32 = arith.constant 0 : i32
    %c0_i32_0 = arith.constant 0 : i32
    %c0_i32_1 = arith.constant 0 : i32
    return %c0_i32, %c0_i32_0 : i32, i32
  }
  func.func @transform_5(%arg0: i32) -> (i32, i32) {
    %c0_i32 = arith.constant 0 : i32
    %c0_i32_0 = arith.constant 0 : i32
    %c0_i32_1 = arith.constant 0 : i32
    return %c0_i32, %c0_i32_0 : i32, i32
  }
  func.func @transform_6(%arg0: i32) -> (i32, i32) {
    %c0_i32 = arith.constant 0 : i32
    %c0_i32_0 = arith.constant 0 : i32
    %c0_i32_1 = arith.constant 0 : i32
    return %c0_i32, %c0_i32_0 : i32, i32
  }
  func.func @transform_7(%arg0: i32) -> (i32, i32) {
    %c0_i32 = arith.constant 0 : i32
    %c0_i32_0 = arith.constant 0 : i32
    %c0_i32_1 = arith.constant 0 : i32
    return %c0_i32, %c0_i32_0 : i32, i32
  }
  func.func @transform_8(%arg0: i32) -> (i32, i32) {
    %c0_i32 = arith.constant 0 : i32
    %c0_i32_0 = arith.constant 0 : i32
    %c0_i32_1 = arith.constant 0 : i32
    return %c0_i32, %c0_i32_0 : i32, i32
  }
  func.func @transform_9(%arg0: i32) -> (i32, i32) {
    %c0_i32 = arith.constant 0 : i32
    %c0_i32_0 = arith.constant 0 : i32
    %c0_i32_1 = arith.constant 0 : i32
    return %c0_i32, %c0_i32_0 : i32, i32
  }
  func.func @transform_10(%arg0: i32) -> (i32, i32) {
    %c0_i32 = arith.constant 0 : i32
    %c0_i32_0 = arith.constant 0 : i32
    %c0_i32_1 = arith.constant 0 : i32
    return %c0_i32, %c0_i32_0 : i32, i32
  }
  func.func @transform_11(%arg0: i32) -> (i32, i32) {
    %c0_i32 = arith.constant 0 : i32
    %c0_i32_0 = arith.constant 0 : i32
    return %arg0, %c0_i32 : i32, i32
  }
}

</mosaic_0001>

<bundles_post_ra>
// kernel: resnet_layer_forward.1
= control target key start
LH: loop header
LB: loop body
LE: loop exit
PB: predicated region body
PF: predicated region fallthrough
CT: control target
= control target key end

     0   :  { %v852_v1 = vmov 0.0   ;;  %vm853_vm0 = vmmov 0   ;;  %s1269_s0 = inlined_call_operand.vmem [shape: f32[8,128], index: 0, kind: input, shape index: {}]   ;;  %s1270_s1 = inlined_call_operand.vmem [shape: f32[128,128], index: 1, kind: input, shape index: {}]   ;;  %s1271_s2 = inlined_call_operand.vmem [shape: f32[1,128], index: 2, kind: input, shape index: {}]   ;;  %s1272_s3 = inlined_call_operand.vmem [shape: f32[128,128], index: 3, kind: input, shape index: {}]   ;;  %s1273_s4 = inlined_call_operand.vmem [shape: f32[1,128], index: 4, kind: input, shape index: {}]   ;;  %s1274_s5 = inlined_call_operand.vmem [shape: f32[128,128], index: 5, kind: input, shape index: {}]   ;;  %s1275_s6 = inlined_call_operand.vmem [shape: f32[1,128], index: 6, kind: input, shape index: {}]   ;;  %s1276_s7 = inlined_call_operand.vmem [shape: f32[128,128], index: 7, kind: input, shape index: {}]   ;;  %s1277_s8 = inlined_call_operand.vmem [shape: f32[1,128], index: 8, kind: input, shape index: {}]   ;;  %s1278_s9 = inlined_call_operand.vmem [shape: f32[128,128], index: 9, kind: input, shape index: {}]   ;;  %s1279_s10 = inlined_call_operand.vmem [shape: f32[1,128], index: 10, kind: input, shape index: {}]   ;;  %s1280_s11 = inlined_call_operand.hbm [shape: f32[8,128], index: 11, kind: output, shape index: {}]  }
   0x1   :  { %v55_v0 = vld [vmem:[%s1270_s1 + $0x78] sm:$0xff]  ;;  %679 = vmatprep.subr.mxu1 %v852_v1  ;;  %v54_v2 = vld [vmem:[%s1270_s1 + $0x70] sm:$0xff]  ;;  %711 = vmatprep.mubr.msk.f32.mxu1 %vm853_vm0, %v852_v1  ;;  %v53_v3 = vld [vmem:[%s1270_s1 + $0x68] sm:$0xff] }
   0x2   :  { %680 = vmatpush3.msra.mxu1 %v55_v0  ;;  %644 = vmatprep.subr.mxu0 %v852_v1  ;;  %v52_v4 = vld [vmem:[%s1270_s1 + $0x60] sm:$0xff]  ;;  %v89_v5 = vld [vmem:[%s1274_s5 + $0x78] sm:$0xff]  ;;  %v88_v6 = vld [vmem:[%s1274_s5 + $0x70] sm:$0xff] }
   0x3   :  { %681 = vmatprep.subr.mxu1 %v852_v1  ;;  %676 = vmatprep.mubr.msk.f32.mxu0 %vm853_vm0, %v852_v1  ;;  %v51_v7 = vld [vmem:[%s1270_s1 + $0x58] sm:$0xff]  ;;  %v87_v8 = vld [vmem:[%s1274_s5 + $0x68] sm:$0xff]  ;;  %v50_v9 = vld [vmem:[%s1270_s1 + $0x50] sm:$0xff] }
   0x4   :  { %682 = vmatpush3.msra.mxu1 %v54_v2  ;;  %645 = vmatpush3.msra.mxu0 %v89_v5  ;;  %v86_v10 = vld [vmem:[%s1274_s5 + $0x60] sm:$0xff]  ;;  %v49_v11 = vld [vmem:[%s1270_s1 + $0x48] sm:$0xff]  ;;  %v85_v12 = vld [vmem:[%s1274_s5 + $0x58] sm:$0xff] }
   0x5   :  { %683 = vmatprep.subr.mxu1 %v852_v1  ;;  %646 = vmatprep.subr.mxu0 %v852_v1 }
   0x6   :  { %684 = vmatpush3.msra.mxu1 %v53_v3  ;;  %647 = vmatpush3.msra.mxu0 %v88_v6 }
   0x7   :  { %685 = vmatprep.subr.mxu1 %v852_v1  ;;  %648 = vmatprep.subr.mxu0 %v852_v1 }
   0x8   :  { %686 = vmatpush3.msra.mxu1 %v52_v4  ;;  %649 = vmatpush3.msra.mxu0 %v87_v8 }
   0x9   :  { %687 = vmatprep.subr.mxu1 %v852_v1  ;;  %650 = vmatprep.subr.mxu0 %v852_v1 }
   0xa   :  { %688 = vmatpush3.msra.mxu1 %v51_v7  ;;  %651 = vmatpush3.msra.mxu0 %v86_v10 }
   0xb   :  { %689 = vmatprep.subr.mxu1 %v852_v1 }
   0xc   :  { %690 = vmatpush3.msra.mxu1 %v50_v9 }
   0xd   :  { %16 = vsyncpa [#allocation3], 0  ;;  %691 = vmatprep.subr.mxu1 %v852_v1  ;;  %v48_v13 = vld [vmem:[%s1270_s1 + $0x40] sm:$0xff]  ;;  %652 = vmatprep.subr.mxu0 %v852_v1  ;;  %v84_v14 = vld [vmem:[%s1274_s5 + $0x50] sm:$0xff] }
   0xe   :  { %692 = vmatpush3.msra.mxu1 %v49_v11  ;;  %653 = vmatpush3.msra.mxu0 %v85_v12  ;;  %v47_v15 = vld [vmem:[%s1270_s1 + $0x38] sm:$0xff]  ;;  %v83_v16 = vld [vmem:[%s1274_s5 + $0x48] sm:$0xff]  ;;  %v46_v17 = vld [vmem:[%s1270_s1 + $0x30] sm:$0xff] }
   0xf   :  { %693 = vmatprep.subr.mxu1 %v852_v1  ;;  %654 = vmatprep.subr.mxu0 %v852_v1  ;;  %v82_v18 = vld [vmem:[%s1274_s5 + $0x40] sm:$0xff]  ;;  %v45_v19 = vld [vmem:[%s1270_s1 + $0x28] sm:$0xff]  ;;  %v81_v20 = vld [vmem:[%s1274_s5 + $0x38] sm:$0xff] }
  0x10   :  { %694 = vmatpush3.msra.mxu1 %v48_v13  ;;  %655 = vmatpush3.msra.mxu0 %v84_v14  ;;  %v44_v21 = vld [vmem:[%s1270_s1 + $0x20] sm:$0xff]  ;;  %v80_v22 = vld [vmem:[%s1274_s5 + $0x30] sm:$0xff]  ;;  %v43_v23 = vld [vmem:[%s1270_s1 + $0x18] sm:$0xff] }
  0x11   :  { %695 = vmatprep.subr.mxu1 %v852_v1  ;;  %656 = vmatprep.subr.mxu0 %v852_v1  ;;  %v79_v24 = vld [vmem:[%s1274_s5 + $0x28] sm:$0xff]  ;;  %v42_v25 = vld [vmem:[%s1270_s1 + $0x10] sm:$0xff]  ;;  %v78_v26 = vld [vmem:[%s1274_s5 + $0x20] sm:$0xff] }
  0x12   :  { %696 = vmatpush3.msra.mxu1 %v47_v15  ;;  %657 = vmatpush3.msra.mxu0 %v83_v16  ;;  %v41_v27 = vld [vmem:[%s1270_s1 + $0x8] sm:$0xff]  ;;  %v77_v28 = vld [vmem:[%s1274_s5 + $0x18] sm:$0xff]  ;;  %v40_v29 = vld [vmem:[%s1270_s1] sm:$0xff] }
  0x13   :  { %697 = vmatprep.subr.mxu1 %v852_v1  ;;  %658 = vmatprep.subr.mxu0 %v852_v1  ;;  %v76_v30 = vld [vmem:[%s1274_s5 + $0x10] sm:$0xff]  ;;  %v39_v31 = vld [vmem:[%s1269_s0] sm:$0xff]  ;;  %v75_v32 = vld [vmem:[%s1274_s5 + $0x8] sm:$0xff] }
  0x14   :  { %698 = vmatpush3.msra.mxu1 %v46_v17  ;;  %659 = vmatpush3.msra.mxu0 %v82_v18  ;;  %v74_v33 = vld [vmem:[%s1274_s5] sm:$0xff]  ;;  %v72_v34 = vld [vmem:[%s1272_s3 + $0x78] sm:$0xff]  ;;  %v71_v35 = vld [vmem:[%s1272_s3 + $0x70] sm:$0xff] }
  0x15   :  { %699 = vmatprep.subr.mxu1 %v852_v1  ;;  %660 = vmatprep.subr.mxu0 %v852_v1  ;;  %v70_v36 = vld [vmem:[%s1272_s3 + $0x68] sm:$0xff]  ;;  %v69_v37 = vld [vmem:[%s1272_s3 + $0x60] sm:$0xff]  ;;  %v68_v38 = vld [vmem:[%s1272_s3 + $0x58] sm:$0xff] }
  0x16   :  { %700 = vmatpush3.msra.mxu1 %v45_v19  ;;  %661 = vmatpush3.msra.mxu0 %v81_v20  ;;  %v67_v39 = vld [vmem:[%s1272_s3 + $0x50] sm:$0xff]  ;;  %v66_v40 = vld [vmem:[%s1272_s3 + $0x48] sm:$0xff]  ;;  %v65_v41 = vld [vmem:[%s1272_s3 + $0x40] sm:$0xff] }
  0x17   :  { %701 = vmatprep.subr.mxu1 %v852_v1  ;;  %662 = vmatprep.subr.mxu0 %v852_v1  ;;  %v64_v42 = vld [vmem:[%s1272_s3 + $0x38] sm:$0xff]  ;;  %v63_v43 = vld [vmem:[%s1272_s3 + $0x30] sm:$0xff]  ;;  %v62_v44 = vld [vmem:[%s1272_s3 + $0x28] sm:$0xff] }
  0x18   :  { %702 = vmatpush3.msra.mxu1 %v44_v21  ;;  %663 = vmatpush3.msra.mxu0 %v80_v22  ;;  %v61_v45 = vld [vmem:[%s1272_s3 + $0x20] sm:$0xff]  ;;  %v60_v46 = vld [vmem:[%s1272_s3 + $0x18] sm:$0xff]  ;;  %v59_v47 = vld [vmem:[%s1272_s3 + $0x10] sm:$0xff] }
  0x19   :  { %703 = vmatprep.subr.mxu1 %v852_v1  ;;  %664 = vmatprep.subr.mxu0 %v852_v1  ;;  %v58_v48 = vld [vmem:[%s1272_s3 + $0x8] sm:$0xff]  ;;  %v57_v49 = vld [vmem:[%s1272_s3] sm:$0xff]  ;;  %v349_v50 = vld [vmem:[%s1276_s7 + $0x78] sm:$0xff] }
  0x1a   :  { %704 = vmatpush3.msra.mxu1 %v43_v23  ;;  %665 = vmatpush3.msra.mxu0 %v79_v24  ;;  %v348_v51 = vld [vmem:[%s1276_s7 + $0x70] sm:$0xff]  ;;  %v551_v52 = vld [vmem:[%s1271_s2] ss:$0 sm:$0xff]  ;;  %v347_v0 = vld [vmem:[%s1276_s7 + $0x68] sm:$0xff] }
  0x1b   :  { %705 = vmatprep.subr.mxu1 %v852_v1  ;;  %666 = vmatprep.subr.mxu0 %v852_v1  ;;  %v346_v2 = vld [vmem:[%s1276_s7 + $0x60] sm:$0xff]  ;;  %v345_v3 = vld [vmem:[%s1276_s7 + $0x58] sm:$0xff]  ;;  %v344_v4 = vld [vmem:[%s1276_s7 + $0x50] sm:$0xff] }
  0x1c   :  { %706 = vmatpush3.msra.mxu1 %v42_v25  ;;  %667 = vmatpush3.msra.mxu0 %v78_v26  ;;  %v343_v5 = vld [vmem:[%s1276_s7 + $0x48] sm:$0xff]  ;;  %v342_v6 = vld [vmem:[%s1276_s7 + $0x40] sm:$0xff]  ;;  %v341_v7 = vld [vmem:[%s1276_s7 + $0x38] sm:$0xff] }
  0x1d   :  { %707 = vmatprep.subr.mxu1 %v852_v1  ;;  %668 = vmatprep.subr.mxu0 %v852_v1  ;;  %v340_v8 = vld [vmem:[%s1276_s7 + $0x30] sm:$0xff]  ;;  %v339_v9 = vld [vmem:[%s1276_s7 + $0x28] sm:$0xff]  ;;  %v338_v10 = vld [vmem:[%s1276_s7 + $0x20] sm:$0xff] }
  0x1e   :  { %708 = vmatpush3.msra.mxu1 %v41_v27  ;;  %669 = vmatpush3.msra.mxu0 %v77_v28  ;;  %v337_v11 = vld [vmem:[%s1276_s7 + $0x18] sm:$0xff]  ;;  %v336_v12 = vld [vmem:[%s1276_s7 + $0x10] sm:$0xff]  ;;  %v335_v13 = vld [vmem:[%s1276_s7 + $0x8] sm:$0xff] }
  0x1f   :  { %709 = vmatprep.subr.mxu1 %v852_v1  ;;  %670 = vmatprep.subr.mxu0 %v852_v1  ;;  %v334_v14 = vld [vmem:[%s1276_s7] sm:$0xff]  ;;  %v366_v15 = vld [vmem:[%s1278_s9 + $0x78] sm:$0xff]  ;;  %v365_v16 = vld [vmem:[%s1278_s9 + $0x70] sm:$0xff] }
  0x20   :  { %710 = vmatpush3.msra.mxu1 %v40_v29  ;;  %671 = vmatpush3.msra.mxu0 %v76_v30  ;;  %v364_v17 = vld [vmem:[%s1278_s9 + $0x68] sm:$0xff]  ;;  %v550_v18 = vld [vmem:[%s1275_s6] ss:$0 sm:$0xff] }
  0x21   :  { %712 = vmatmul.mubr.f32.vlgmr.msra.gmra.mxu1 %v39_v31  ;;  %672 = vmatprep.subr.mxu0 %v852_v1  ;;  %v553_v19 = vld [vmem:[%s1273_s4] ss:$0 sm:$0xff] }
  0x22   :  { %673 = vmatpush3.msra.mxu0 %v75_v32  ;;  %749 = vmatprep.subr.mxu1 %v852_v1  ;;  %v362_v32 = vld [vmem:[%s1278_s9 + $0x58] sm:$0xff] }
  0x23   :  { %674 = vmatprep.subr.mxu0 %v852_v1  ;;  %781 = vmatprep.mubr.msk.f32.mxu1 %vm853_vm0, %v852_v1 }
  0x24   :  { %675 = vmatpush3.msra.mxu0 %v74_v33  ;;  %750 = vmatpush3.msra.mxu1 %v349_v50  ;;  %v361_v33 = vld [vmem:[%s1278_s9 + $0x50] sm:$0xff] }
  0x25   :  { %677 = vmatmul.mubr.f32.vlgmr.msra.gmra.mxu0 %v39_v31  ;;  %714 = vmatprep.subr.mxu0 %v852_v1  ;;  %v363_v31 = vld [vmem:[%s1278_s9 + $0x60] sm:$0xff] }
  0x26   :  { %715 = vmatpush3.msra.mxu0 %v72_v34  ;;  %746 = vmatprep.mubr.msk.f32.mxu0 %vm853_vm0, %v852_v1  ;;  %v360_v34 = vld [vmem:[%s1278_s9 + $0x48] sm:$0xff] }
  0x27   :  { %716 = vmatprep.subr.mxu0 %v852_v1  ;;  %751 = vmatprep.subr.mxu1 %v852_v1 }
  0x28   :  { %717 = vmatpush3.msra.mxu0 %v71_v35  ;;  %752 = vmatpush3.msra.mxu1 %v348_v51  ;;  %v359_v35 = vld [vmem:[%s1278_s9 + $0x40] sm:$0xff] }
  0x29   :  { %718 = vmatprep.subr.mxu0 %v852_v1  ;;  %753 = vmatprep.subr.mxu1 %v852_v1 }
  0x2a   :  { %719 = vmatpush3.msra.mxu0 %v70_v36  ;;  %754 = vmatpush3.msra.mxu1 %v347_v0  ;;  %v358_v36 = vld [vmem:[%s1278_s9 + $0x38] sm:$0xff] }
  0x2b   :  { %720 = vmatprep.subr.mxu0 %v852_v1  ;;  %755 = vmatprep.subr.mxu1 %v852_v1 }
  0x2c   :  { %721 = vmatpush3.msra.mxu0 %v69_v37  ;;  %756 = vmatpush3.msra.mxu1 %v346_v2  ;;  %v357_v37 = vld [vmem:[%s1278_s9 + $0x30] sm:$0xff] }
  0x2d   :  { %722 = vmatprep.subr.mxu0 %v852_v1  ;;  %757 = vmatprep.subr.mxu1 %v852_v1 }
  0x2e   :  { %723 = vmatpush3.msra.mxu0 %v68_v38  ;;  %758 = vmatpush3.msra.mxu1 %v345_v3  ;;  %v356_v38 = vld [vmem:[%s1278_s9 + $0x28] sm:$0xff] }
  0x2f   :  { %724 = vmatprep.subr.mxu0 %v852_v1  ;;  %759 = vmatprep.subr.mxu1 %v852_v1 }
  0x30   :  { %725 = vmatpush3.msra.mxu0 %v67_v39  ;;  %760 = vmatpush3.msra.mxu1 %v344_v4  ;;  %v355_v39 = vld [vmem:[%s1278_s9 + $0x20] sm:$0xff] }
  0x31   :  { %726 = vmatprep.subr.mxu0 %v852_v1  ;;  %761 = vmatprep.subr.mxu1 %v852_v1 }
  0x32   :  { %727 = vmatpush3.msra.mxu0 %v66_v40  ;;  %762 = vmatpush3.msra.mxu1 %v343_v5  ;;  %v354_v40 = vld [vmem:[%s1278_s9 + $0x18] sm:$0xff] }
  0x33   :  { %728 = vmatprep.subr.mxu0 %v852_v1  ;;  %763 = vmatprep.subr.mxu1 %v852_v1 }
  0x34   :  { %729 = vmatpush3.msra.mxu0 %v65_v41  ;;  %764 = vmatpush3.msra.mxu1 %v342_v6  ;;  %v353_v41 = vld [vmem:[%s1278_s9 + $0x10] sm:$0xff] }
  0x35   :  { %730 = vmatprep.subr.mxu0 %v852_v1  ;;  %765 = vmatprep.subr.mxu1 %v852_v1 }
  0x36   :  { %731 = vmatpush3.msra.mxu0 %v64_v42  ;;  %766 = vmatpush3.msra.mxu1 %v341_v7  ;;  %v352_v42 = vld [vmem:[%s1278_s9 + $0x8] sm:$0xff] }
  0x37   :  { %732 = vmatprep.subr.mxu0 %v852_v1  ;;  %767 = vmatprep.subr.mxu1 %v852_v1 }
  0x38   :  { %733 = vmatpush3.msra.mxu0 %v63_v43  ;;  %768 = vmatpush3.msra.mxu1 %v340_v8  ;;  %v351_v43 = vld [vmem:[%s1278_s9] sm:$0xff] }
  0x39   :  { %734 = vmatprep.subr.mxu0 %v852_v1  ;;  %769 = vmatprep.subr.mxu1 %v852_v1 }
  0x3a   :  { %735 = vmatpush3.msra.mxu0 %v62_v44  ;;  %770 = vmatpush3.msra.mxu1 %v339_v9  ;;  %v555_v44 = vld [vmem:[%s1277_s8] ss:$0 sm:$0xff]  ;;  %s854_s8 = smov [#allocation2]  }
  0x3b   :  { %736 = vmatprep.subr.mxu0 %v852_v1  ;;  %771 = vmatprep.subr.mxu1 %v852_v1  ;;  %s542_s9 = sshll.u32 %s854_s8, 4  ;;  %s543_s9 = int_to_ptr.vmem [resolvable:$true] %s542_s9 }
  0x3c   :  { %737 = vmatpush3.msra.mxu0 %v61_v45  ;;  %772 = vmatpush3.msra.mxu1 %v338_v10  ;;  %s830_s29 = scalar_lea.vmem %s543_s9, 128  ;;  %p835_p1 = scmp.lt.s32.totalorder %s543_s9, %s543_s9 }
  0x3d   :  { %738 = vmatprep.subr.mxu0 %v852_v1  ;;  %773 = vmatprep.subr.mxu1 %v852_v1  ;;  %p831_p0 = scmp.ne.s32.totalorder %s543_s9, %s830_s29  ;;  %p836_p2 = scmp.lt.s32.totalorder %s830_s29, %s830_s29 }
  0x3e   :  { %739 = vmatpush3.msra.mxu0 %v60_v46  ;;  %774 = vmatpush3.msra.mxu1 %v337_v11 }
  0x3f   :  { %740 = vmatprep.subr.mxu0 %v852_v1  ;;  %775 = vmatprep.subr.mxu1 %v852_v1  ;;  %p837_p3 = por %p836_p2, %p835_p1 }
  0x40   :  { %741 = vmatpush3.msra.mxu0 %v59_v47  ;;  %776 = vmatpush3.msra.mxu1 %v336_v12 }
  0x41   :  { %742 = vmatprep.subr.mxu0 %v852_v1  ;;  %777 = vmatprep.subr.mxu1 %v852_v1  ;;  %p838_p4 = pnand %p837_p3, %p831_p0 }
  0x42   :  { %743 = vmatpush3.msra.mxu0 %v58_v48  ;;  %778 = vmatpush3.msra.mxu1 %v335_v13 }
  0x43   :  { %744 = vmatprep.subr.mxu0 %v852_v1  ;;  %779 = vmatprep.subr.mxu1 %v852_v1 }
  0x44   :  { %745 = vmatpush3.msra.mxu0 %v57_v49  ;;  %780 = vmatpush3.msra.mxu1 %v334_v14 }
  0x45   :  { %784 = vmatprep.subr.mxu0 %v852_v1 }
  0xe1   :  { %v239_v53 = vpop.f32.mrf.mxu1 }
  0xe2   :  { %v240_v54 = vadd.f32 %v551_v52, %v239_v53  ;;  %v557_v53 = vld [vmem:[%s1279_s10] ss:$0 sm:$0xff] }
  0xe3   :  { %v713_v55 = vpop.f32.mrf.mxu1 }
  0xe4   :  { %v244_v56 = vmul.f32 1.442695, %v240_v54  ;;  %vm243_vm1 = vcmp.gt.f32.partialorder %v240_v54, 0.0 }
  0xe5   :  { %v1131_v57 = vpop.f32.mrf.mxu0 }
  0xe6   :  { %822 = vpow2.f32 %v244_v56  ;;  %v164_v21 = vadd.f32 %v550_v18, %v1131_v57 }
  0xe7   :  { %v678_v58 = vpop.f32.mrf.mxu0 }
  0xf3   :  { %v823_v59 = vpop.eup %822 }
  0xf4   :  { %v552_v60 = vadd.f32 -1.0, %v823_v59 }
  0xf6   :  { %v247_v61 = vmul.f32 1.6732632, %v552_v60 }
  0xf8   :  { %v248_v62 = vsel %vm243_vm1, %v240_v54, %v247_v61 }
  0xf9   :  { %v249_v63 = vmul.f32 1.050701, %v248_v62 }
  0xfb   :  { %747 = vmatmul.mubr.f32.vlgmr.msra.gmra.mxu0 %v249_v63 }
  0xfc   :  { %816 = vmatprep.mubr.msk.f32.mxu0 %vm853_vm0, %v852_v1  ;;  %785 = vmatpush3.msra.mxu0 %v366_v15 }
  0xfd   :  { %786 = vmatprep.subr.mxu0 %v852_v1 }
  0xfe   :  { %787 = vmatpush3.msra.mxu0 %v365_v16 }
  0xff   :  { %788 = vmatprep.subr.mxu0 %v852_v1 }
 0x100   :  { %789 = vmatpush3.msra.mxu0 %v364_v17 }
 0x101   :  { %790 = vmatprep.subr.mxu0 %v852_v1 }
 0x102   :  { %791 = vmatpush3.msra.mxu0 %v363_v31 }
 0x103   :  { %792 = vmatprep.subr.mxu0 %v852_v1 }
 0x104   :  { %793 = vmatpush3.msra.mxu0 %v362_v32 }
 0x105   :  { %794 = vmatprep.subr.mxu0 %v852_v1 }
 0x106   :  { %795 = vmatpush3.msra.mxu0 %v361_v33 }
 0x107   :  { %796 = vmatprep.subr.mxu0 %v852_v1 }
 0x108   :  { %797 = vmatpush3.msra.mxu0 %v360_v34 }
 0x109   :  { %798 = vmatprep.subr.mxu0 %v852_v1 }
 0x10a   :  { %799 = vmatpush3.msra.mxu0 %v359_v35 }
 0x10b   :  { %800 = vmatprep.subr.mxu0 %v852_v1 }
 0x10c   :  { %801 = vmatpush3.msra.mxu0 %v358_v36 }
 0x10d   :  { %802 = vmatprep.subr.mxu0 %v852_v1 }
 0x10e   :  { %803 = vmatpush3.msra.mxu0 %v357_v37 }
 0x10f   :  { %804 = vmatprep.subr.mxu0 %v852_v1 }
 0x110   :  { %805 = vmatpush3.msra.mxu0 %v356_v38 }
 0x111   :  { %806 = vmatprep.subr.mxu0 %v852_v1 }
 0x112   :  { %807 = vmatpush3.msra.mxu0 %v355_v39 }
 0x113   :  { %808 = vmatprep.subr.mxu0 %v852_v1 }
 0x114   :  { %809 = vmatpush3.msra.mxu0 %v354_v40 }
 0x115   :  { %810 = vmatprep.subr.mxu0 %v852_v1 }
 0x116   :  { %811 = vmatpush3.msra.mxu0 %v353_v41 }
 0x117   :  { %812 = vmatprep.subr.mxu0 %v852_v1 }
 0x118   :  { %813 = vmatpush3.msra.mxu0 %v352_v42 }
 0x119   :  { %814 = vmatprep.subr.mxu0 %v852_v1 }
 0x11a   :  { %815 = vmatpush3.msra.mxu0 %v351_v43 }
 0x1bb   :  { %v322_v20 = vpop.f32.mrf.mxu0 }
 0x1bc   :  { %v323_v22 = vadd.f32 %v553_v19, %v322_v20 }
 0x1bd   :  { %v748_v23 = vpop.f32.mrf.mxu0 }
 0x1be   :  { %v326_v24 = vadd.f32 %v323_v22, %v164_v21 }
 0x1c0   :  { %v328_v25 = vmul.f32 1.442695, %v326_v24  ;;  %vm327_vm2 = vcmp.gt.f32.partialorder %v326_v24, 0.0 }
 0x1c2   :  { %824 = vpow2.f32 %v328_v25 }
 0x1cf   :  { %v825_v26 = vpop.eup %824 }
 0x1d0   :  { %v554_v27 = vadd.f32 -1.0, %v825_v26 }
 0x1d2   :  { %v331_v28 = vmul.f32 1.6732632, %v554_v27 }
 0x1d4   :  { %v332_v29 = vsel %vm327_vm2, %v326_v24, %v331_v28 }
 0x1d5   :  { %v333_v30 = vmul.f32 1.050701, %v332_v29 }
 0x1d7   :  { %782 = vmatmul.mubr.f32.vlgmr.msra.gmra.mxu1 %v333_v30 }
 0x297   :  { %v440_v45 = vpop.f32.mrf.mxu1 }
 0x298   :  { %v441_v46 = vadd.f32 %v555_v44, %v440_v45 }
 0x299   :  { %v783_v47 = vpop.f32.mrf.mxu1 }
 0x29a   :  { %v445_v48 = vmul.f32 1.442695, %v441_v46  ;;  %vm444_vm3 = vcmp.gt.f32.partialorder %v441_v46, 0.0 }
 0x29c   :  { %826 = vpow2.f32 %v445_v48 }
 0x2a9   :  { %v827_v49 = vpop.eup %826 }
 0x2aa   :  { %v556_v50 = vadd.f32 -1.0, %v827_v49 }
 0x2ac   :  { %v448_v51 = vmul.f32 1.6732632, %v556_v50 }
 0x2ae   :  { %v449_v52 = vsel %vm444_vm3, %v441_v46, %v448_v51 }
 0x2af   :  { %v450_v1 = vmul.f32 1.050701, %v449_v52 }
 0x2b1   :  { %817 = vmatmul.mubr.f32.vlgmr.msra.gmra.mxu0 %v450_v1 }
 0x371   :  { %v523_v54 = vpop.f32.mrf.mxu0 }
 0x372   :  { %v524_v55 = vadd.f32 %v557_v53, %v523_v54 }
 0x373   :  { %v818_v56 = vpop.f32.mrf.mxu0 }
 0x374   :  { %v527_v57 = vadd.f32 %v524_v55, %v333_v30 }
 0x376   :  { %v529_v58 = vmul.f32 1.442695, %v527_v57  ;;  %vm528_vm4 = vcmp.gt.f32.partialorder %v527_v57, 0.0 }
 0x378   :  { %828 = vpow2.f32 %v529_v58 }
 0x385   :  { %v829_v59 = vpop.eup %828 }
 0x386   :  { %v558_v60 = vadd.f32 -1.0, %v829_v59 }
 0x388   :  { %v532_v61 = vmul.f32 1.6732632, %v558_v60 }
 0x38a   :  { %v533_v62 = vsel %vm528_vm4, %v527_v57, %v532_v61 }
 0x38b   :  { %v534_v63 = vmul.f32 1.050701, %v533_v62 }
 0x38d   :  { %535 = vst [vmem:[#allocation2] sm:$0xff] %v534_v63 }
 0x38e   :  { %841 = shalt.err (!%p838_p4)
}
 0x38f   :  { %545 = dma.vmem_to_hbm [thread:$0]  %s543_s9, 128, %s1280_s11, [#allocation3]  }
 0x390   :  { %850 = dma.done.wait [#allocation3], 128  }
 0x391   :  { %851 = vsyncadd [#allocation3], 4294967168 }
 0x392   :  { %549 = vsyncpa [#allocation3], 1 }

</bundles_post_ra>
